<compile_context>
chip_gen: v5e
topology: v5e:2x2
jax: 0.10.0
libtpu: 0.0.40
codegen_flags: <defaults>
</compile_context>

<pallas_src>
import functools
import math

import jax
import jax.numpy as jnp
from jax import lax
from jax.experimental import pallas as pl
from jax.experimental.pallas import tpu as pltpu


def _round_up(x, m):
    return ((x + m - 1) // m) * m


def _choose_tile(n, target, align):
    """Aligned tile <= target that splits (padded) n as evenly as possible."""
    n_al = _round_up(max(n, align), align)
    t = max(align, min(_round_up(target, align), n_al))
    ntiles = -(-n_al // t)
    return _round_up(-(-n_al // ntiles), align)


def _lm_head_kernel(x_ref, wd_ref, bd_ref, g_ref, b_ref, emb_ref, bias_ref,
                    out_ref, h_scratch, *, eps):
    """Fused dense -> gelu -> layernorm -> vocab-projection kernel.

    Grid = (token_tiles, vocab_tiles), vocab innermost. h_scratch persists
    across the inner vocab loop of each token tile (written at j==0, read by
    every j). Relies on the vocab axis being "arbitrary" (sequential).
    """
    j = pl.program_id(1)

    @pl.when(j == 0)
    def _():
        # dense: bf16 x bf16 -> f32 accumulation on the MXU
        h = jnp.dot(x_ref[...], wd_ref[...],
                    preferred_element_type=jnp.float32) + bd_ref[...]
        # exact gelu (erf), matches torch / DeBERTa ACT2FN['gelu']; f32 math
        h = 0.5 * h * (1.0 + lax.erf(h * (1.0 / math.sqrt(2.0))))
        # LayerNorm over embedding dim with affine params; f32 math
        mu = jnp.mean(h, axis=-1, keepdims=True)
        var = jnp.mean(jnp.square(h - mu), axis=-1, keepdims=True)
        h = (h - mu) * lax.rsqrt(var + eps)
        h = h * g_ref[...] + b_ref[...]
        # store bf16 so the vocab matmul is a bf16 x bf16 MXU op
        h_scratch[...] = h.astype(h_scratch.dtype)

    # vocab projection: contract last dims of [tm,E] and [tv,E] directly
    # (no in-kernel transpose of the embedding tile).
    logits = lax.dot_general(
        h_scratch[...], emb_ref[...],
        dimension_numbers=(((1,), (1,)), ((), ())),
        preferred_element_type=jnp.float32) + bias_ref[...]
    out_ref[...] = logits.astype(out_ref.dtype)


def bert_lm_prediction_head(hidden_states, dense_w, dense_b, ln_gamma, ln_beta,
                            embedding_weight, vocab_bias, *,
                            eps=1e-7, tm=512, tv=512, out_dtype=None):
    """hidden_states: [B, S, H]; embedding_weight: [V, E]; returns [B, S, V]."""
    B, S, H = hidden_states.shape
    E = dense_w.shape[1]
    V = embedding_weight.shape[0]
    N = B * S
    if out_dtype is None:
        out_dtype = hidden_states.dtype

    # Even-split, HW-aligned tiles: token tile multiple of 8 (sublanes),
    # vocab tile multiple of 128 (lanes). Keeps padding waste minimal.
    tm = _choose_tile(N, tm, 8)
    tv = _choose_tile(V, tv, 128)
    Np = _round_up(N, tm)
    Vp = _round_up(V, tv)

    # bf16 operands for the MXU matmuls (f32 accumulation inside the kernel);
    # biases / LayerNorm params stay f32.
    x2 = hidden_states.reshape(N, H).astype(jnp.bfloat16)
    wd = dense_w.astype(jnp.bfloat16)
    emb = embedding_weight.astype(jnp.bfloat16)
    bd2 = dense_b.reshape(1, E).astype(jnp.float32)
    g2 = ln_gamma.reshape(1, E).astype(jnp.float32)
    b2 = ln_beta.reshape(1, E).astype(jnp.float32)
    bias2 = vocab_bias.reshape(1, V).astype(jnp.float32)

    # Pad to tile multiples; padded rows/cols are zero and sliced off afterwards.
    if Np != N:
        x2 = jnp.pad(x2, ((0, Np - N), (0, 0)))
    if Vp != V:
        emb = jnp.pad(emb, ((0, Vp - V), (0, 0)))
        bias2 = jnp.pad(bias2, ((0, 0), (0, Vp - V)))

    # VMEM budget from actual tile footprint (double-buffered DMA tiles),
    # with headroom, capped below v7x's 64 MiB physical VMEM.
    out_itemsize = jnp.dtype(out_dtype).itemsize
    vmem_need = (2 * (tm * H + H * E + tv * E) * 2      # x / dense-w / emb tiles (bf16)
                 + 2 * tm * tv * out_itemsize           # output tile
                 + tm * E * 2                           # h_scratch
                 + 8 * (E + tv) * 4)                    # biases / LN params
    vmem_limit = int(min(max(32 * 1024 * 1024, 2 * vmem_need), 64 * 1024 * 1024))

    out = pl.pallas_call(
        functools.partial(_lm_head_kernel, eps=eps),
        out_shape=jax.ShapeDtypeStruct((Np, Vp), out_dtype),
        grid_spec=pltpu.PrefetchScalarGridSpec(
            num_scalar_prefetch=0,
            grid=(Np // tm, Vp // tv),
            in_specs=[
                pl.BlockSpec((tm, H), lambda i, j: (i, 0)),   # x token tile (bf16)
                pl.BlockSpec((H, E), lambda i, j: (0, 0)),    # dense weight (bf16)
                pl.BlockSpec((1, E), lambda i, j: (0, 0)),    # dense bias (f32)
                pl.BlockSpec((1, E), lambda i, j: (0, 0)),    # LN gamma (f32)
                pl.BlockSpec((1, E), lambda i, j: (0, 0)),    # LN beta (f32)
                pl.BlockSpec((tv, E), lambda i, j: (j, 0)),   # embedding rows (bf16)
                pl.BlockSpec((1, tv), lambda i, j: (0, j)),   # vocab bias (f32)
            ],
            out_specs=pl.BlockSpec((tm, tv), lambda i, j: (i, j)),
            scratch_shapes=[pltpu.VMEM((tm, E), jnp.bfloat16)],
        ),
        compiler_params=pltpu.CompilerParams(
            dimension_semantics=("parallel", "arbitrary"),
            vmem_limit_bytes=vmem_limit),
    )(x2, wd, bd2, g2, b2, emb, bias2)

    return out[:N, :V].reshape(B, S, V)


def _reference(hidden_states, dense_w, dense_b, ln_gamma, ln_beta,
               embedding_weight, vocab_bias, eps=1e-7):
    h = jnp.einsum("bsh,he->bse", hidden_states, dense_w) + dense_b
    h = 0.5 * h * (1.0 + lax.erf(h / math.sqrt(2.0)))
    mu = jnp.mean(h, axis=-1, keepdims=True)
    var = jnp.mean(jnp.square(h - mu), axis=-1, keepdims=True)
    h = (h - mu) * lax.rsqrt(var + eps) * ln_gamma + ln_beta
    return jnp.einsum("bse,ve->bsv", h, embedding_weight) + vocab_bias


if __name__ == "__main__":
    # Small shapes; non-divisible N (=14) and V (=300) exercise the padding path.
    B, S, H, E, V = 2, 7, 32, 32, 300
    eps = 1e-7  # DeBERTa layer_norm_eps

    key = jax.random.PRNGKey(0)
    k_x, k_emb, k_wd, k_bd = jax.random.split(key, 4)

    # Forward inputs
    hidden_states = jax.random.normal(k_x, (B, S, H), dtype=jnp.float32)
    embedding_weight = jax.random.normal(k_emb, (V, E), dtype=jnp.float32) * 0.05

    # Parameters (deterministic, per __init__ shapes)
    dense_w = jax.random.normal(k_wd, (H, E), dtype=jnp.float32) * (1.0 / math.sqrt(H))
    dense_b = jax.random.normal(k_bd, (E,), dtype=jnp.float32) * 0.01
    ln_gamma = jnp.ones((E,), dtype=jnp.float32)
    ln_beta = jnp.zeros((E,), dtype=jnp.float32)
    vocab_bias = jnp.zeros((V,), dtype=jnp.float32)  # nn.Parameter(torch.zeros(vocab_size))

    logits = bert_lm_prediction_head(hidden_states, dense_w, dense_b,
                                     ln_gamma, ln_beta, embedding_weight,
                                     vocab_bias, eps=eps)
    logits = jax.block_until_ready(logits)

    ref = _reference(hidden_states, dense_w, dense_b, ln_gamma, ln_beta,
                     embedding_weight, vocab_bias, eps=eps)
    assert logits.shape == (B, S, V)
    # bf16 matmul operands vs f32 reference -> bf16-level tolerance
    assert jnp.allclose(logits, ref, atol=2e-2, rtol=2e-2), "mismatch vs reference"

    print("KERNEL_OK")
</pallas_src>

<mosaic_0001>
module attributes {stable_mosaic.version = 11 : i64} {
  func.func @_lm_head_kernel(%arg0: i32, %arg1: i32, %arg2: memref<16x32xbf16, #tpu.memory_space<vmem>>, %arg3: memref<32x32xbf16, #tpu.memory_space<vmem>>, %arg4: memref<1x32xf32, #tpu.memory_space<vmem>>, %arg5: memref<1x32xf32, #tpu.memory_space<vmem>>, %arg6: memref<1x32xf32, #tpu.memory_space<vmem>>, %arg7: memref<384x32xbf16, #tpu.memory_space<vmem>>, %arg8: memref<1x384xf32, #tpu.memory_space<vmem>>, %arg9: memref<16x384xf32, #tpu.memory_space<vmem>>, %arg10: memref<16x32xbf16, #tpu.memory_space<vmem>>) attributes {dimension_semantics = [#tpu.dimension_semantics<parallel>, #tpu.dimension_semantics<arbitrary>], iteration_bounds = array<i64: 1, 1>, scalar_prefetch = 0 : i64, scratch_operands = 1 : i64, tpu.core_type = #tpu.core_type<tc>, window_params = [{transform_indices = @transform_0, window_bounds = array<i64: 16, 32>}, {pipeline_mode = #tpu.pipeline_mode<synchronous>, transform_indices = @transform_1, window_bounds = array<i64: 32, 32>}, {pipeline_mode = #tpu.pipeline_mode<synchronous>, transform_indices = @transform_2, window_bounds = array<i64: 1, 32>}, {pipeline_mode = #tpu.pipeline_mode<synchronous>, transform_indices = @transform_3, window_bounds = array<i64: 1, 32>}, {pipeline_mode = #tpu.pipeline_mode<synchronous>, transform_indices = @transform_4, window_bounds = array<i64: 1, 32>}, {transform_indices = @transform_5, window_bounds = array<i64: 384, 32>}, {transform_indices = @transform_6, window_bounds = array<i64: 1, 384>}, {transform_indices = @transform_7, window_bounds = array<i64: 16, 384>}]} {
    %c0_i32 = arith.constant 0 : i32
    %0 = arith.cmpi eq, %arg1, %c0_i32 : i32
    %1 = arith.extui %0 : i1 to i32
    %c0_i32_0 = arith.constant 0 : i32
    %2 = arith.cmpi ne, %1, %c0_i32_0 : i32
    scf.if %2 {
      %c0_8 = arith.constant 0 : index
      %c0_9 = arith.constant 0 : index
      %10 = vector.load %arg2[%c0_8, %c0_9] : memref<16x32xbf16, #tpu.memory_space<vmem>>, vector<16x32xbf16>
      %c0_10 = arith.constant 0 : index
      %c0_11 = arith.constant 0 : index
      %11 = vector.load %arg3[%c0_10, %c0_11] : memref<32x32xbf16, #tpu.memory_space<vmem>>, vector<32x32xbf16>
      %cst_12 = arith.constant dense<0.000000e+00> : vector<16x32xf32>
      %12 = tpu.matmul %10, %11, %cst_12 {dimension_numbers = #tpu.dot_dimension_numbers<[1], [0], [0], [1], [0, 0, 1, 1], [], []>} : vector<16x32xbf16>, vector<32x32xbf16>, vector<16x32xf32> -> vector<16x32xf32>
      %c0_13 = arith.constant 0 : index
      %c0_14 = arith.constant 0 : index
      %13 = vector.load %arg4[%c0_13, %c0_14] : memref<1x32xf32, #tpu.memory_space<vmem>>, vector<1x32xf32>
      %14 = vector.broadcast %13 : vector<1x32xf32> to vector<16x32xf32>
      %15 = arith.addf %12, %14 : vector<16x32xf32>
      %cst_15 = arith.constant 5.000000e-01 : f32
      %16 = vector.broadcast %cst_15 : f32 to vector<16x32xf32>
      %17 = arith.mulf %16, %15 : vector<16x32xf32>
      %cst_16 = arith.constant 0.707106769 : f32
      %18 = vector.broadcast %cst_16 : f32 to vector<16x32xf32>
      %19 = arith.mulf %15, %18 : vector<16x32xf32>
      %20 = math.erf %19 : vector<16x32xf32>
      %cst_17 = arith.constant 1.000000e+00 : f32
      %21 = vector.broadcast %cst_17 : f32 to vector<16x32xf32>
      %22 = arith.addf %21, %20 : vector<16x32xf32>
      %23 = arith.mulf %17, %22 : vector<16x32xf32>
      %cst_18 = arith.constant dense<0.000000e+00> : vector<16xf32>
      %24 = vector.multi_reduction <add>, %23, %cst_18 [1] : vector<16x32xf32> to vector<16xf32>
      %25 = vector.shape_cast %24 : vector<16xf32> to vector<16x1xf32>
      %cst_19 = arith.constant 3.200000e+01 : f32
      %26 = vector.broadcast %cst_19 : f32 to vector<16x1xf32>
      %27 = arith.divf %25, %26 : vector<16x1xf32>
      %28 = vector.broadcast %27 : vector<16x1xf32> to vector<16x32xf32>
      %29 = arith.subf %23, %28 : vector<16x32xf32>
      %30 = arith.mulf %29, %29 : vector<16x32xf32>
      %cst_20 = arith.constant dense<0.000000e+00> : vector<16xf32>
      %31 = vector.multi_reduction <add>, %30, %cst_20 [1] : vector<16x32xf32> to vector<16xf32>
      %32 = vector.shape_cast %31 : vector<16xf32> to vector<16x1xf32>
      %cst_21 = arith.constant 3.200000e+01 : f32
      %33 = vector.broadcast %cst_21 : f32 to vector<16x1xf32>
      %34 = arith.divf %32, %33 : vector<16x1xf32>
      %35 = vector.broadcast %27 : vector<16x1xf32> to vector<16x32xf32>
      %36 = arith.subf %23, %35 : vector<16x32xf32>
      %cst_22 = arith.constant 1.000000e-07 : f32
      %37 = vector.broadcast %cst_22 : f32 to vector<16x1xf32>
      %38 = arith.addf %34, %37 : vector<16x1xf32>
      %39 = math.rsqrt %38 : vector<16x1xf32>
      %40 = vector.broadcast %39 : vector<16x1xf32> to vector<16x32xf32>
      %41 = arith.mulf %36, %40 : vector<16x32xf32>
      %c0_23 = arith.constant 0 : index
      %c0_24 = arith.constant 0 : index
      %42 = vector.load %arg5[%c0_23, %c0_24] : memref<1x32xf32, #tpu.memory_space<vmem>>, vector<1x32xf32>
      %43 = vector.broadcast %42 : vector<1x32xf32> to vector<16x32xf32>
      %44 = arith.mulf %41, %43 : vector<16x32xf32>
      %c0_25 = arith.constant 0 : index
      %c0_26 = arith.constant 0 : index
      %45 = vector.load %arg6[%c0_25, %c0_26] : memref<1x32xf32, #tpu.memory_space<vmem>>, vector<1x32xf32>
      %46 = vector.broadcast %45 : vector<1x32xf32> to vector<16x32xf32>
      %47 = arith.addf %44, %46 : vector<16x32xf32>
      %48 = arith.truncf %47 : vector<16x32xf32> to vector<16x32xbf16>
      %c0_27 = arith.constant 0 : index
      %c0_28 = arith.constant 0 : index
      %49 = vector.load %arg10[%c0_27, %c0_28] : memref<16x32xbf16, #tpu.memory_space<vmem>>, vector<16x32xbf16>
      tpu.vector_store %arg10[%c0_27, %c0_28], %48 {strides = array<i32>} : memref<16x32xbf16, #tpu.memory_space<vmem>>, vector<16x32xbf16>,
    } else {
    }
    %c0 = arith.constant 0 : index
    %c0_1 = arith.constant 0 : index
    %3 = vector.load %arg10[%c0, %c0_1] : memref<16x32xbf16, #tpu.memory_space<vmem>>, vector<16x32xbf16>
    %c0_2 = arith.constant 0 : index
    %c0_3 = arith.constant 0 : index
    %4 = vector.load %arg7[%c0_2, %c0_3] : memref<384x32xbf16, #tpu.memory_space<vmem>>, vector<384x32xbf16>
    %cst = arith.constant dense<0.000000e+00> : vector<16x384xf32>
    %5 = tpu.matmul %3, %4, %cst {dimension_numbers = #tpu.dot_dimension_numbers<[1], [1], [0], [0], [0, 0, 1, 0], [], []>} : vector<16x32xbf16>, vector<384x32xbf16>, vector<16x384xf32> -> vector<16x384xf32>
    %c0_4 = arith.constant 0 : index
    %c0_5 = arith.constant 0 : index
    %6 = vector.load %arg8[%c0_4, %c0_5] : memref<1x384xf32, #tpu.memory_space<vmem>>, vector<1x384xf32>
    %7 = vector.broadcast %6 : vector<1x384xf32> to vector<16x384xf32>
    %8 = arith.addf %5, %7 : vector<16x384xf32>
    %c0_6 = arith.constant 0 : index
    %c0_7 = arith.constant 0 : index
    %9 = vector.load %arg9[%c0_6, %c0_7] : memref<16x384xf32, #tpu.memory_space<vmem>>, vector<16x384xf32>
    tpu.vector_store %arg9[%c0_6, %c0_7], %8 {strides = array<i32>} : memref<16x384xf32, #tpu.memory_space<vmem>>, vector<16x384xf32>,
    return
  }
  func.func @transform_0(%arg0: i32, %arg1: i32) -> (i32, i32) {
    %c0_i32 = arith.constant 0 : i32
    %c0_i32_0 = arith.constant 0 : i32
    return %arg0, %c0_i32 : i32, i32
  }
  func.func @transform_1(%arg0: i32, %arg1: i32) -> (i32, i32) {
    %c0_i32 = arith.constant 0 : i32
    %c0_i32_0 = arith.constant 0 : i32
    %c0_i32_1 = arith.constant 0 : i32
    return %c0_i32, %c0_i32_0 : i32, i32
  }
  func.func @transform_2(%arg0: i32, %arg1: i32) -> (i32, i32) {
    %c0_i32 = arith.constant 0 : i32
    %c0_i32_0 = arith.constant 0 : i32
    %c0_i32_1 = arith.constant 0 : i32
    return %c0_i32, %c0_i32_0 : i32, i32
  }
  func.func @transform_3(%arg0: i32, %arg1: i32) -> (i32, i32) {
    %c0_i32 = arith.constant 0 : i32
    %c0_i32_0 = arith.constant 0 : i32
    %c0_i32_1 = arith.constant 0 : i32
    return %c0_i32, %c0_i32_0 : i32, i32
  }
  func.func @transform_4(%arg0: i32, %arg1: i32) -> (i32, i32) {
    %c0_i32 = arith.constant 0 : i32
    %c0_i32_0 = arith.constant 0 : i32
    %c0_i32_1 = arith.constant 0 : i32
    return %c0_i32, %c0_i32_0 : i32, i32
  }
  func.func @transform_5(%arg0: i32, %arg1: i32) -> (i32, i32) {
    %c0_i32 = arith.constant 0 : i32
    %c0_i32_0 = arith.constant 0 : i32
    return %arg1, %c0_i32 : i32, i32
  }
  func.func @transform_6(%arg0: i32, %arg1: i32) -> (i32, i32) {
    %c0_i32 = arith.constant 0 : i32
    %c0_i32_0 = arith.constant 0 : i32
    return %c0_i32, %arg1 : i32, i32
  }
  func.func @transform_7(%arg0: i32, %arg1: i32) -> (i32, i32) {
    %c0_i32 = arith.constant 0 : i32
    return %arg0, %arg1 : i32, i32
  }
}

</mosaic_0001>

<bundles_post_ra>
// kernel: tpu_custom_call.1
= control target key start
LH: loop header
LB: loop body
LE: loop exit
PB: predicated region body
PF: predicated region fallthrough
CT: control target
= control target key end

     0   :  { %s948_s0 = inlined_call_operand.vmem [shape: bf16[16,32], index: 0, kind: input, shape index: {}]   ;;  %s949_s1 = inlined_call_operand.vmem [shape: bf16[32,32], index: 1, kind: input, shape index: {}]   ;;  %s950_s2 = inlined_call_operand.vmem [shape: f32[1,32], index: 2, kind: input, shape index: {}]   ;;  %s951_s3 = inlined_call_operand.vmem [shape: f32[1,32], index: 3, kind: input, shape index: {}]   ;;  %s952_s4 = inlined_call_operand.vmem [shape: f32[1,32], index: 4, kind: input, shape index: {}]   ;;  %s953_s5 = inlined_call_operand.vmem [shape: bf16[384,32], index: 5, kind: input, shape index: {}]   ;;  %s954_s6 = inlined_call_operand.vmem [shape: f32[1,384], index: 6, kind: input, shape index: {}]   ;;  %s955_s7 = inlined_call_operand.hbm [shape: f32[16,384], index: 7, kind: output, shape index: {}]  }
   0x1   :  { %v678_v0 = vld [vmem:[%s949_s1 + $0x8] sm:$0xff]  ;;  %v677_v1 = vld [vmem:[%s949_s1] sm:$0xff] }
   0x2   :  { %69 = vmatpush.bf16.msra.mxu0 %v678_v0 }
   0x3   :  { %12 = vsyncpa [#allocation4], 0  ;;  %v676_v2 = vld [vmem:[%s948_s0] sm:$0xff]  ;;  %vm59_vm0 = vcmask 261120   ;;  %vm230_vm14 = vcmask 257024   ;;  %s748_s8 = smov [#allocation3]  }
   0x4   :  { %v708_v3 = vld [vmem:[%s950_s2] ss:$0 sm:$0xff]  ;;  %s544_s0 = sshll.u32 %s748_s8, 4  ;;  %s749_s9 = smov 384   ;;  %s545_s0 = int_to_ptr.vmem [resolvable:$true] %s544_s0 }
   0x5   :  { %s750_s10 = smov 24  }
   0x6   :  { %70 = vmatpush.bf16.msra.mxu0 %v677_v1 }
   0x9   :  { %570 = vmatmul.msk.bf16.vlgmr.msra.gmra.mxu0 %vm59_vm0, %v676_v2 }
  0x86   :  { %v72_v4 = vpop.f32.mrf.mxu0 }
  0x87   :  { %v804_v5 = vadd.f32 %v708_v3, %v72_v4 }
  0x89   :  { %v79_v6 = vmul.f32 0.70710677, %v804_v5 }
  0x8b   :  { %v81_v7 = vmul.f32 %v79_v6, %v79_v6 }
  0x8d   :  { %v82_v8 = vmin.f32 %v81_v7, 16.0 }
  0x8e   :  { %v74_v9 = vpop.f32.mrf.mxu0 }
  0x8f   :  { %v83_v10 = vmul.f32 2.1237322e-06, %v82_v8  ;;  %v807_v11 = vadd.f32 %v708_v3, %v74_v9  ;;  %v94_v12 = vmul.f32 3.8918573e-05, %v82_v8 }
  0x91   :  { %v84_v13 = vadd.f32 0.00028619796, %v83_v10  ;;  %v810_v14 = vmul.f32 0.70710677, %v807_v11  ;;  %v95_v15 = vadd.f32 0.001143296, %v94_v12 }
  0x93   :  { %v85_v16 = vmul.f32 %v84_v13, %v82_v8  ;;  %v121_v17 = vmul.f32 %v810_v14, %v810_v14  ;;  %v96_v18 = vmul.f32 %v95_v15, %v82_v8  ;;  %v77_v13 = vmul.f32 0.5, %v804_v5 }
  0x95   :  { %v122_v19 = vmin.f32 %v121_v17, 16.0  ;;  %v97_v20 = vadd.f32 0.014752088, %v96_v18  ;;  %v86_v21 = vadd.f32 0.0036580483, %v85_v16 }
  0x97   :  { %v123_v22 = vmul.f32 2.1237322e-06, %v122_v19  ;;  %v134_v23 = vmul.f32 3.8918573e-05, %v122_v19  ;;  %v98_v24 = vmul.f32 %v97_v20, %v82_v8  ;;  %v87_v28 = vmul.f32 %v86_v21, %v82_v8 }
  0x99   :  { %v124_v25 = vadd.f32 0.00028619796, %v123_v22  ;;  %v135_v26 = vadd.f32 0.001143296, %v134_v23  ;;  %v99_v27 = vadd.f32 0.112945676, %v98_v24 }
  0x9a   :  { %v88_v35 = vadd.f32 0.05243302, %v87_v28  ;;  %v78_v23 = vmul.f32 0.5, %v807_v11  ;;  %v687_v28 = vld [vmem:[%s953_s5 + $0x38] sm:$0xff] }
  0x9b   :  { %v125_v29 = vmul.f32 %v124_v25, %v122_v19  ;;  %v136_v30 = vmul.f32 %v135_v26, %v122_v19  ;;  %v100_v31 = vmul.f32 %v99_v27, %v82_v8  ;;  %v747_v26 = vmov 32.0   ;;  %v703_v11 = vld [vmem:[%s953_s5 + $0xb8] sm:$0xff] }
  0x9c   :  { %v89_v41 = vmul.f32 %v88_v35, %v82_v8  ;;  %v694_v35 = vld [vmem:[%s953_s5 + $0x70] sm:$0xff] }
  0x9d   :  { %v137_v32 = vadd.f32 0.014752088, %v136_v30  ;;  %v126_v33 = vadd.f32 0.0036580483, %v125_v29  ;;  %v101_v34 = vadd.f32 0.4994258, %v100_v31 }
  0x9e   :  { %v90_v45 = vadd.f32 0.18741608, %v89_v41  ;;  %v695_v29 = vld [vmem:[%s953_s5 + $0x78] sm:$0xff]  ;;  %v442_v31 = vsel %vm59_vm0, %v687_v28, 0 }
  0x9f   :  { %v138_v36 = vmul.f32 %v137_v32, %v122_v19  ;;  %v102_v37 = vmul.f32 %v101_v34, %v82_v8  ;;  %v127_v39 = vmul.f32 %v126_v33, %v122_v19  ;;  %v466_v32 = vsel %vm59_vm0, %v695_v29, 0  ;;  %492 = vmatpush.bf16.xpose.msra.mxu1 %v442_v31  ;;  %v686_v34 = vld [vmem:[%s953_s5 + $0x30] sm:$0xff] }
  0xa0   :  { %v91_v50 = vmul.f32 %v90_v45, %v82_v8  ;;  %v490_v33 = vsel %vm59_vm0, %v703_v11, 0  ;;  %506 = vmatpush.bf16.xpose.msra.mxu2 %v466_v32 }
  0xa1   :  { %v139_v38 = vadd.f32 0.112945676, %v138_v36  ;;  %v103_v40 = vadd.f32 1.0, %v102_v37  ;;  %v128_v44 = vadd.f32 0.05243302, %v127_v39  ;;  %520 = vmatpush.bf16.xpose.msra.mxu3 %v490_v33  ;;  %v702_v36 = vld [vmem:[%s953_s5 + $0xb0] sm:$0xff] }
  0xa2   :  { %v92_v55 = vadd.f32 1.1283791, %v91_v50  ;;  %v463_v39 = vsel %vm59_vm0, %v694_v35, 0 }
  0xa3   :  { %v140_v42 = vmul.f32 %v139_v38, %v122_v19  ;;  %711 = vrcp.f32 %v103_v40  ;;  %v129_v49 = vmul.f32 %v128_v44, %v122_v19  ;;  %v115_v54 = vand.u32 2147483648, %v103_v40 }
  0xa4   :  { %v113_v57 = vand.u32 2147483647, %v103_v40  ;;  %vm109_vm2 = vweird.f32 %v103_v40  ;;  %v93_v63 = vmul.f32 %v92_v55, %v79_v6  ;;  %v439_v38 = vsel %vm59_vm0, %v686_v34, 0  ;;  %v701_v55 = vld [vmem:[%s953_s5 + $0xa8] sm:$0xff] }
  0xa5   :  { %v141_v43 = vadd.f32 0.4994258, %v140_v42  ;;  %v130_v53 = vadd.f32 0.18741608, %v129_v49  ;;  %v116_v61 = vor.u32 1.1754944e-38, %v115_v54  ;;  %v693_v54 = vld [vmem:[%s953_s5 + $0x68] sm:$0xff] }
  0xa6   :  { %vm114_vm4 = vcmp.eq.f32.partialorder %v113_v57, 8.507059e+37  ;;  %v460_v57 = vsel %vm59_vm0, %v693_v54, 0 }
  0xa7   :  { %v142_v46 = vmul.f32 %v141_v43, %v122_v19  ;;  %v131_v60 = vmul.f32 %v130_v53, %v122_v19  ;;  %493 = vmatpush.bf16.xpose.msra.mxu1 %v439_v38  ;;  %v685_v53 = vld [vmem:[%s953_s5 + $0x28] sm:$0xff] }
  0xa8   :  { %507 = vmatpush.bf16.xpose.msra.mxu2 %v463_v39  ;;  %v709_v39 = vld [vmem:[%s951_s3] ss:$0 sm:$0xff] }
  0xa9   :  { %v143_v47 = vadd.f32 1.0, %v142_v46  ;;  %v712_v48 = vpop.eup %711  ;;  %v132_v7 = vadd.f32 1.1283791, %v131_v60  ;;  %v692_v60 = vld [vmem:[%s953_s5 + $0x60] sm:$0xff] }
  0xaa   :  { %v105_v51 = vmul.f32 %v712_v48, %v103_v40  ;;  %vm110_vm1 = vweird.f32 %v712_v48  ;;  %v487_v40 = vsel %vm59_vm0, %v702_v36, 0 }
  0xab   :  { %713 = vrcp.f32 %v143_v47  ;;  %vm111_vm3 = vmor %vm109_vm2, %vm110_vm1  ;;  %v155_v4 = vand.u32 2147483648, %v143_v47  ;;  %v153_v9 = vand.u32 2147483647, %v143_v47  ;;  %vm149_vm6 = vweird.f32 %v143_v47  ;;  %521 = vmatpush.bf16.xpose.msra.mxu3 %v487_v40 }
  0xac   :  { %v106_v52 = vsub.f32 1.0, %v105_v51  ;;  %v133_v6 = vmul.f32 %v132_v7, %v810_v14  ;;  %715 = vrcp.f32 %v747_v26  ;;  %v696_v26 = vld [vmem:[%s953_s5 + $0x80] sm:$0xff] }
  0xad   :  { %v156_v16 = vor.u32 1.1754944e-38, %v155_v4  ;;  %vm154_vm8 = vcmp.eq.f32.partialorder %v153_v9, 8.507059e+37  ;;  %v682_v9 = vld [vmem:[%s953_s5 + $0x10] sm:$0xff]  ;;  %v469_v29 = vsel %vm59_vm0, %v696_v26, 0 }
  0xae   :  { %v107_v56 = vmul.f32 %v712_v48, %v106_v52 }
  0xb0   :  { %v108_v59 = vadd.f32 %v712_v48, %v107_v56  ;;  %v436_v56 = vsel %vm59_vm0, %v685_v53, 0  ;;  %508 = vmatpush.bf16.xpose.msra.mxu2 %v460_v57 }
  0xb1   :  { %v714_v58 = vpop.eup %713  ;;  %494 = vmatpush.bf16.xpose.msra.mxu1 %v436_v56 }
  0xb2   :  { %v145_v62 = vmul.f32 %v714_v58, %v143_v47  ;;  %v112_v0 = vsel %vm111_vm3, %v712_v48, %v108_v59  ;;  %vm150_vm5 = vweird.f32 %v714_v58  ;;  %v716_v27 = vpop.eup %715  ;;  %v684_v59 = vld [vmem:[%s953_s5 + $0x20] sm:$0xff] }
  0xb3   :  { %v117_v1 = vsel %vm114_vm4, %v116_v61, %v112_v0  ;;  %vm151_vm7 = vmor %vm149_vm6, %vm150_vm5  ;;  %v172_v14 = vmul.f32 32.0, %v716_v27  ;;  %vm176_vm9 = vweird.f32 %v716_v27  ;;  %v700_v61 = vld [vmem:[%s953_s5 + $0xa0] sm:$0xff] }
  0xb4   :  { %v146_v2 = vsub.f32 1.0, %v145_v62  ;;  %v118_v3 = vmul.f32 %v117_v1, %v93_v63  ;;  %v433_v62 = vsel %vm59_vm0, %v684_v59, 0  ;;  %v457_v63 = vsel %vm59_vm0, %v692_v60, 0  ;;  %v683_v1 = vld [vmem:[%s953_s5 + $0x18] sm:$0xff] }
  0xb5   :  { %v173_v30 = vsub.f32 1.0, %v172_v14  ;;  %v481_v0 = vsel %vm59_vm0, %v700_v61, 0  ;;  %v430_v4 = vsel %vm59_vm0, %v683_v1, 0 }
  0xb6   :  { %v147_v8 = vmul.f32 %v714_v58, %v146_v2  ;;  %v571_v10 = vclamps-f32 %v118_v3, 1.0  ;;  %v691_v2 = vld [vmem:[%s953_s5 + $0x58] sm:$0xff] }
  0xb7   :  { %v174_v37 = vmul.f32 %v716_v27, %v173_v30  ;;  %v699_v3 = vld [vmem:[%s953_s5 + $0x98] sm:$0xff]  ;;  %v454_v7 = vsel %vm59_vm0, %v691_v2, 0 }
  0xb8   :  { %v148_v12 = vadd.f32 %v714_v58, %v147_v8  ;;  %v161_v15 = vadd.f32 1.0, %v571_v10  ;;  %509 = vmatpush.bf16.xpose.msra.mxu2 %v457_v63  ;;  %v478_v8 = vsel %vm59_vm0, %v699_v3, 0  ;;  %v690_v10 = vld [vmem:[%s953_s5 + $0x50] sm:$0xff] }
  0xb9   :  { %v175_v41 = vadd.f32 %v716_v27, %v174_v37  ;;  %495 = vmatpush.bf16.xpose.msra.mxu1 %v433_v62 }
  0xba   :  { %v152_v17 = vsel %vm151_vm7, %v714_v58, %v148_v12  ;;  %v163_v18 = vmul.f32 %v161_v15, %v77_v13  ;;  %v484_v58 = vsel %vm59_vm0, %v701_v55, 0  ;;  %v698_v12 = vld [vmem:[%s953_s5 + $0x90] sm:$0xff]  ;;  %v427_v13 = vsel %vm59_vm0, %v682_v9, 0 }
  0xbb   :  { %v157_v19 = vsel %vm154_vm8, %v156_v16, %v152_v17  ;;  %v843_v42 = vsel %vm176_vm9, %v716_v27, %v175_v41  ;;  %522 = vmatpush.bf16.xpose.msra.mxu3 %v484_v58  ;;  %v451_v15 = vsel %vm59_vm0, %v690_v10, 0  ;;  %v475_v16 = vsel %vm59_vm0, %v698_v12, 0  ;;  %v689_v17 = vld [vmem:[%s953_s5 + $0x48] sm:$0xff] }
  0xbc   :  { %v158_v20 = vmul.f32 %v157_v19, %v133_v6  ;;  %v165_v21 = vsel %vm59_vm0, %v163_v18, 0.0  ;;  %v681_v6 = vld [vmem:[%s953_s5 + $0x8] sm:$0xff] }
  0xbd   :  { %166 = vadd.xlane.f32.xlu0 %v165_v21  ;;  %v448_v21 = vsel %vm59_vm0, %v689_v17, 0 }
  0xbe   :  { %v572_v22 = vclamps-f32 %v158_v20, 1.0  ;;  %v424_v20 = vsel %vm59_vm0, %v681_v6, 0 }
  0xc0   :  { %v162_v24 = vadd.f32 1.0, %v572_v22  ;;  %510 = vmatpush.bf16.xpose.msra.mxu2 %v454_v7 }
  0xc1   :  { %496 = vmatpush.bf16.xpose.msra.mxu1 %v430_v4 }
  0xc2   :  { %v164_v25 = vmul.f32 %v162_v24, %v78_v23 }
  0xc3   :  { %523 = vmatpush.bf16.xpose.msra.mxu3 %v481_v0 }
  0xc4   :  { %v168_v5 = vsel %vm59_vm0, %v164_v25, 0.0 }
  0xc5   :  { %169 = vadd.xlane.f32.xlu0 %v168_v5  ;;  %v688_v5 = vld [vmem:[%s953_s5 + $0x40] sm:$0xff] }
  0xc6   :  { %v445_v28 = vsel %vm59_vm0, %v688_v5, 0 }
  0xc8   :  { %511 = vmatpush.bf16.xpose.msra.mxu2 %v451_v15 }
  0xc9   :  { %497 = vmatpush.bf16.xpose.msra.mxu1 %v427_v13 }
  0xcb   :  { %524 = vmatpush.bf16.xpose.msra.mxu3 %v478_v8 }
  0xd0   :  { %512 = vmatpush.bf16.xpose.msra.mxu2 %v448_v21 }
  0xd1   :  { %498 = vmatpush.bf16.xpose.msra.mxu1 %v424_v20 }
  0xd3   :  { %525 = vmatpush.bf16.xpose.msra.mxu3 %v475_v16 }
  0xd8   :  { %513 = vmatpush.bf16.xpose.msra.mxu2 %v445_v28 }
 0x130   :  { %v167_v43 = vpop.xlane.xlu0 %166 }
 0x131   :  { %v178_v44 = vmul.f32 %v843_v42, %v167_v43 }
 0x133   :  { %v846_v45 = vsub.f32 %v163_v18, %v178_v44  ;;  %v697_v18 = vld [vmem:[%s953_s5 + $0x88] sm:$0xff] }
 0x134   :  { %v472_v22 = vsel %vm59_vm0, %v697_v18, 0 }
 0x135   :  { %v182_v46 = vmul.f32 %v846_v45, %v846_v45  ;;  %526 = vmatpush.bf16.xpose.msra.mxu3 %v472_v22 }
 0x137   :  { %v184_v47 = vsel %vm59_vm0, %v182_v46, 0.0 }
 0x138   :  { %185 = vadd.xlane.f32.xlu1 %v184_v47  ;;  %v170_v48 = vpop.xlane.xlu0 %169 }
 0x139   :  { %v179_v49 = vmul.f32 %v843_v42, %v170_v48 }
 0x13b   :  { %v852_v50 = vsub.f32 %v164_v25, %v179_v49  ;;  %v680_v25 = vld [vmem:[%s953_s5] sm:$0xff] }
 0x13c   :  { %v421_v14 = vsel %vm59_vm0, %v680_v25, 0 }
 0x13d   :  { %v183_v51 = vmul.f32 %v852_v50, %v852_v50  ;;  %499 = vmatpush.bf16.xpose.msra.mxu1 %v421_v14  ;;  %527 = vmatpush.bf16.xpose.msra.mxu3 %v469_v29 }
 0x13f   :  { %v187_v52 = vsel %vm59_vm0, %v183_v51, 0.0 }
 0x140   :  { %188 = vadd.xlane.f32.xlu1 %v187_v52 }
 0x1ab   :  { %v186_v19 = vpop.xlane.xlu1 %185 }
 0x1ac   :  { %v190_v23 = vmul.f32 %v186_v19, %v843_v42 }
 0x1ae   :  { %v192_v24 = vadd.f32 1e-07, %v190_v23 }
 0x1b0   :  { %717 = vrsqrt.f32 %v192_v24  ;;  %vm200_vm11 = vweird.f32 %v192_v24 }
 0x1b3   :  { %v189_v27 = vpop.xlane.xlu1 %188 }
 0x1b4   :  { %v191_v11 = vmul.f32 %v189_v27, %v843_v42  ;;  %v710_v42 = vld [vmem:[%s952_s4] ss:$0 sm:$0xff] }
 0x1b6   :  { %v718_v30 = vpop.eup %717  ;;  %v193_v31 = vadd.f32 1e-07, %v191_v11 }
 0x1b7   :  { %v195_v32 = vmul.f32 %v718_v30, %v192_v24  ;;  %vm201_vm10 = vweird.f32 %v718_v30 }
 0x1b8   :  { %719 = vrsqrt.f32 %v193_v31  ;;  %vm202_vm12 = vmor %vm200_vm11, %vm201_vm10  ;;  %vm210_vm15 = vweird.f32 %v193_v31 }
 0x1b9   :  { %v196_v33 = vmul.f32 %v718_v30, %v195_v32 }
 0x1bb   :  { %v197_v34 = vmul.f32 0.5, %v196_v33 }
 0x1bd   :  { %v198_v35 = vsub.f32 1.5, %v197_v34 }
 0x1be   :  { %v720_v36 = vpop.eup %719 }
 0x1bf   :  { %v199_v37 = vmul.f32 %v718_v30, %v198_v35  ;;  %v205_v38 = vmul.f32 %v720_v36, %v193_v31  ;;  %vm211_vm13 = vweird.f32 %v720_v36 }
 0x1c0   :  { %vm212_vm1 = vmor %vm210_vm15, %vm211_vm13 }
 0x1c1   :  { %v203_v40 = vsel %vm202_vm12, %v718_v30, %v199_v37  ;;  %v206_v41 = vmul.f32 %v720_v36, %v205_v38 }
 0x1c2   :  { %v214_v43 = vmul.f32 %v203_v40, %v846_v45  ;;  %v283_v45 = vld [vmem:[%s954_s6] sm:$0x7]  ;;  %s546_s6 = sshll.u32 %s955_s7, 4  ;;  %s547_s6 = int_to_ptr.hbm [resolvable:$true] %s546_s6 }
 0x1c3   :  { %v207_v44 = vmul.f32 0.5, %v206_v41  ;;  %v285_v58 = vperm.slane %v283_v45, 0  ;;  %v287_v61 = vperm.slane %v283_v45, 2 }
 0x1c4   :  { %v220_v46 = vmul.f32 %v709_v39, %v214_v43 }
 0x1c5   :  { %v208_v47 = vsub.f32 1.5, %v207_v44 }
 0x1c6   :  { %v226_v48 = vadd.f32 %v710_v42, %v220_v46 }
 0x1c7   :  { %v209_v49 = vmul.f32 %v720_v36, %v208_v47 }
 0x1c8   :  { %v228_v51 = vpack.c.bf16 %v226_v48, %v226_v48 }
 0x1c9   :  { %v213_v52 = vsel %vm212_vm1, %v720_v36, %v209_v49 }
 0x1ca   :  { %231 = vst.msk [vmem:[#allocation2] sm:$0xf] %vm230_vm14, %v228_v51  ;;  %v215_v53 = vmul.f32 %v213_v52, %v852_v50  ;;  %v286_v50 = vperm.slane %v283_v45, 1 }
 0x1cc   :  { %v221_v54 = vmul.f32 %v709_v39, %v215_v53 }
 0x1ce   :  { %v227_v55 = vadd.f32 %v710_v42, %v221_v54 }
 0x1d0   :  { %v229_v56 = vpack.c.bf16 %v227_v55, %v227_v55 }
 0x1d2   :  { %232 = vst.msk [vmem:[#allocation2 + $0x4] sm:$0xf] %vm230_vm14, %v229_v56 }
 0x1d9   :  { %v679_v57 = vld [vmem:[#allocation2] sm:$0xff] }
 0x1da   :  { %673 = vmatmul.msk.bf16.vlgmr.msra.gmra.mxu1 %vm59_vm0, %v679_v57  ;;  %674 = vmatmul.msk.bf16.vlgmr.msra.gmra.mxu2 %vm59_vm0, %v679_v57 }
 0x1db   :  { %675 = vmatmul.msk.bf16.vlgmr.msra.gmra.mxu3 %vm59_vm0, %v679_v57 }
 0x257   :  { %v501_v59 = vpop.f32.mrf.mxu1 }
 0x258   :  { %v502_v60 = vadd.f32 %v501_v59, %v285_v58 }
 0x25a   :  { %534 = vst [vmem:[#allocation3] sm:$0xff] %v502_v60 }
 0x25d   :  { %v515_v62 = vpop.f32.mrf.mxu2 }
 0x25e   :  { %v516_v63 = vadd.f32 %v515_v62, %v286_v50  ;;  %v529_v0 = vpop.f32.mrf.mxu3 }
 0x25f   :  { %v530_v1 = vadd.f32 %v529_v0, %v287_v61  ;;  %v503_v2 = vpop.f32.mrf.mxu1 }
 0x260   :  { %535 = vst [vmem:[#allocation3 + $0x8] sm:$0xff] %v516_v63  ;;  %v504_v3 = vadd.f32 %v503_v2, %v285_v58 }
 0x261   :  { %536 = vst [vmem:[#allocation3 + $0x10] sm:$0xff] %v530_v1 }
 0x262   :  { %537 = vst [vmem:[#allocation3 + $0x18] sm:$0xff] %v504_v3 }
 0x265   :  { %v517_v4 = vpop.f32.mrf.mxu2 }
 0x266   :  { %v518_v7 = vadd.f32 %v517_v4, %v286_v50  ;;  %v531_v8 = vpop.f32.mrf.mxu3 }
 0x267   :  { %v532_v9 = vadd.f32 %v531_v8, %v287_v61 }
 0x268   :  { %538 = vst [vmem:[#allocation3 + $0x20] sm:$0xff] %v518_v7 }
 0x269   :  { %539 = vst [vmem:[#allocation3 + $0x28] sm:$0xff] %v532_v9 }
 0x26a   :  { %552 = dma.vmem_to_hbm [thread:$0]  %s545_s0, 768, %s547_s6, [#allocation4], %s749_s9, %s749_s9, %s750_s10  }
 0x26b   :  { %745 = dma.done.wait [#allocation4], 768  }
 0x26c   :  { %746 = vsyncadd [#allocation4], 4294966528 }
 0x26d   :  { %557 = vsyncpa [#allocation4], 1 }

</bundles_post_ra>
